<compile_context>
chip_gen: v6e
topology: v6e:2x2x1
jax: 0.10.0
libtpu: 0.0.40
codegen_flags: <defaults>
</compile_context>

<pallas_src>
import functools

import jax
import jax.numpy as jnp
from jax.experimental import pallas as pl
from jax.experimental.pallas import tpu as pltpu

_LN_EPS = 1e-5      # PyTorch nn.LayerNorm default eps
_NEG_INF = -1e30    # additive mask for padded key columns


def _layernorm(x, g, b):
    mu = jnp.mean(x, axis=-1, keepdims=True)
    var = jnp.mean(jnp.square(x - mu), axis=-1, keepdims=True)
    return (x - mu) * jax.lax.rsqrt(var + _LN_EPS) * g + b


def _round_up(x, m):
    return (x + m - 1) // m * m


_VMEM_LIMIT_CACHE = None


def _vmem_limit_bytes():
    """Explicit VMEM budget: ~3/4 of physical capacity (v7x-safe), 48 MiB fallback."""
    global _VMEM_LIMIT_CACHE
    if _VMEM_LIMIT_CACHE is None:
        try:
            cap = int(pltpu.get_tpu_info().vmem_capacity_bytes)
            _VMEM_LIMIT_CACHE = int(cap * 3 // 4)
        except Exception:
            _VMEM_LIMIT_CACHE = 48 * 1024 * 1024
    return _VMEM_LIMIT_CACHE


# ---------------------------------------------------------------------------
# PreNorm + multi-head Attention + residual kernel: grid = (batch,)
# Weights are fully VMEM-resident (constant index_maps); heads handled in-kernel.
# ---------------------------------------------------------------------------
def _attn_kernel(x_ref, g_ref, b_ref, wqkv_ref, wo_ref, bo_ref, o_ref, *,
                 heads, dim_head, seq_len, scale, compute_dtype):
    Sp = x_ref.shape[1]
    inner = heads * dim_head
    approx = compute_dtype != jnp.float32

    x = x_ref[0].astype(jnp.float32)                                    # (Sp, D)
    xn = _layernorm(x, g_ref[...], b_ref[...]).astype(compute_dtype)

    # One all-head QKV projection: (Sp, D) @ (D, 3*inner) — fills the MXU.
    qkv = jnp.dot(xn, wqkv_ref[...], preferred_element_type=jnp.float32)

    if seq_len != Sp:  # padded keys -> mask before softmax
        key_valid = jax.lax.broadcasted_iota(jnp.int32, (Sp, Sp), 1) < seq_len
    else:
        key_valid = None

    head_outs = []
    for h in range(heads):
        q = qkv[:, h * dim_head:(h + 1) * dim_head].astype(compute_dtype)
        k = qkv[:, inner + h * dim_head:inner + (h + 1) * dim_head].astype(compute_dtype)
        v = qkv[:, 2 * inner + h * dim_head:2 * inner + (h + 1) * dim_head].astype(compute_dtype)

        dots = jnp.dot(q, k.T, preferred_element_type=jnp.float32) * scale   # (Sp, Sp)
        if key_valid is not None:
            dots = jnp.where(key_valid, dots, _NEG_INF)
        dots = dots - jnp.max(dots, axis=-1, keepdims=True)
        p = jnp.exp(dots)
        denom = jnp.sum(p, axis=-1, keepdims=True)
        if approx:
            attn = p * pl.reciprocal(denom, approx=True)   # EUP slot, frees VALU
        else:
            attn = p / denom                               # exact path for f32 check
        head_outs.append(jnp.dot(attn.astype(compute_dtype), v,
                                 preferred_element_type=jnp.float32))   # (Sp, dh)

    out = jnp.concatenate(head_outs, axis=-1).astype(compute_dtype)     # (Sp, inner)
    proj = jnp.dot(out, wo_ref[...], preferred_element_type=jnp.float32)
    o_ref[0] = (x + proj + bo_ref[...]).astype(o_ref.dtype)


def prenorm_attention(x, p, *, heads, dim_head):
    """Returns x + Attention(LayerNorm(x)).  x: (B, S, D); p: prepared params."""
    B, S, D = x.shape
    inner = heads * dim_head
    wqkv, wo = p["wqkv"], p["wo"]
    compute_dtype = wqkv.dtype
    scale = float(dim_head) ** -0.5

    # Pad S so the (S, S) score / softmax block is lane/sublane dense.
    Sp = _round_up(S, 128) if S > 96 else _round_up(S, 8)
    xp = x if Sp == S else jnp.pad(x, ((0, 0), (0, Sp - S), (0, 0)))

    w_item = jnp.dtype(compute_dtype).itemsize
    cost = pl.CostEstimate(
        flops=int(2 * B * Sp * D * 3 * inner
                  + 2 * B * heads * Sp * Sp * dim_head * 2
                  + 2 * B * Sp * inner * D),
        transcendentals=int(B * heads * Sp * Sp),
        bytes_accessed=int(2 * B * Sp * D * x.dtype.itemsize
                           + 4 * D * inner * w_item + 3 * D * 4),
    )

    kernel = functools.partial(_attn_kernel, heads=heads, dim_head=dim_head,
                               seq_len=S, scale=scale, compute_dtype=compute_dtype)
    out = pl.pallas_call(
        kernel,
        out_shape=jax.ShapeDtypeStruct((B, Sp, D), x.dtype),
        grid_spec=pltpu.PrefetchScalarGridSpec(
            num_scalar_prefetch=0,
            grid=(B,),
            in_specs=[
                pl.BlockSpec((1, Sp, D), lambda b: (b, 0, 0)),      # x[b] (native dtype)
                pl.BlockSpec((1, D), lambda b: (0, 0)),             # LN gamma
                pl.BlockSpec((1, D), lambda b: (0, 0)),             # LN beta
                pl.BlockSpec((D, 3 * inner), lambda b: (0, 0)),     # wqkv (resident)
                pl.BlockSpec((inner, D), lambda b: (0, 0)),         # wo   (resident)
                pl.BlockSpec((1, D), lambda b: (0, 0)),             # out-proj bias
            ],
            out_specs=pl.BlockSpec((1, Sp, D), lambda b: (b, 0, 0)),
        ),
        compiler_params=pltpu.CompilerParams(
            dimension_semantics=("parallel",),
            vmem_limit_bytes=_vmem_limit_bytes()),
        cost_estimate=cost,
    )(xp, p["ln1_g"], p["ln1_b"], wqkv, wo, p["bo"])
    return out if Sp == S else out[:, :S]


# ---------------------------------------------------------------------------
# PreNorm + FFN (Linear -> GELU -> Linear) + residual kernel:
# grid = (token_tiles, hidden_tiles); hidden_tiles == 1 when w1/w2 fit VMEM.
# ---------------------------------------------------------------------------
def _ffn_kernel(x_ref, g_ref, b_ref, w1_ref, b1_ref, w2_ref, b2_ref,
                o_ref, xn_ref, acc_ref, *, compute_dtype):
    h = pl.program_id(1)

    @pl.when(h == 0)
    def _():
        x = x_ref[...].astype(jnp.float32)                          # (tm, D)
        xn_ref[...] = _layernorm(x, g_ref[...], b_ref[...]).astype(xn_ref.dtype)
        acc_ref[...] = jnp.zeros_like(acc_ref)

    xn = xn_ref[...]                                                # compute_dtype cache
    hid = jnp.dot(xn, w1_ref[...], preferred_element_type=jnp.float32) + b1_ref[...]
    # Exact erf GELU (== F.gelu default), kept in f32 for correctness.
    # TODO(synk): on v6e/v7x (bf16 VALU) this could run in bf16 for a ~1.3-1.8x VPU win.
    act = jax.nn.gelu(hid, approximate=False)
    acc_ref[...] += jnp.dot(act.astype(compute_dtype), w2_ref[...],
                            preferred_element_type=jnp.float32)

    @pl.when(h == pl.num_programs(1) - 1)
    def _():
        o_ref[...] = (acc_ref[...] + b2_ref[...]
                      + x_ref[...].astype(jnp.float32)).astype(o_ref.dtype)


def _pick_hidden_tile(H, D, itemsize, budget_bytes):
    """Full H (weights resident, read once) when they fit the budget, else the
    largest multiple of 128 dividing H whose w1+w2 column slabs fit."""
    if 2 * D * H * itemsize <= budget_bytes:
        return H
    if H % 128 != 0:
        # TODO(synk): pad H to a multiple of 128 instead of forcing full residency.
        return H
    best = 128
    t = 256
    while t < H:
        if H % t == 0 and 2 * D * t * itemsize <= budget_bytes:
            best = t
        t += 128
    return best


def prenorm_ffn(x, p, *, tm=512, weight_resident_bytes=24 * 1024 * 1024):
    """Returns x + FFN(LayerNorm(x)).  x: (B, S, D); p: prepared params."""
    B, S, D = x.shape
    w1, w2 = p["w1"], p["w2"]
    H = w1.shape[1]
    compute_dtype = w1.dtype
    itemsize = jnp.dtype(compute_dtype).itemsize
    M = B * S

    tm = min(tm, _round_up(M, 8))      # token tile: multiple of 8
    Mp = _round_up(M, tm)              # pad tokens instead of asserting divisibility
    th = _pick_hidden_tile(H, D, itemsize, weight_resident_bytes)

    x2d = x.reshape(M, D)              # native dtype: no wrapper-side f32 copy
    if Mp != M:
        x2d = jnp.pad(x2d, ((0, Mp - M), (0, 0)))

    n_weight_reads = 1 if th == H else Mp // tm
    cost = pl.CostEstimate(
        flops=int(4 * Mp * D * H),
        transcendentals=int(Mp * H),
        bytes_accessed=int(2 * Mp * D * x.dtype.itemsize
                           + n_weight_reads * 2 * D * H * itemsize
                           + (H + 3 * D) * 4),
    )

    kernel = functools.partial(_ffn_kernel, compute_dtype=compute_dtype)
    out2d = pl.pallas_call(
        kernel,
        out_shape=jax.ShapeDtypeStruct((Mp, D), x.dtype),
        grid_spec=pltpu.PrefetchScalarGridSpec(
            num_scalar_prefetch=0,
            grid=(Mp // tm, H // th),
            in_specs=[
                pl.BlockSpec((tm, D), lambda i, h: (i, 0)),   # x tile (resident over h)
                pl.BlockSpec((1, D), lambda i, h: (0, 0)),    # LN gamma
                pl.BlockSpec((1, D), lambda i, h: (0, 0)),    # LN beta
                pl.BlockSpec((D, th), lambda i, h: (0, h)),   # w1 (resident when th == H)
                pl.BlockSpec((1, th), lambda i, h: (0, h)),   # b1
                pl.BlockSpec((th, D), lambda i, h: (h, 0)),   # w2 (resident when th == H)
                pl.BlockSpec((1, D), lambda i, h: (0, 0)),    # b2
            ],
            out_specs=pl.BlockSpec((tm, D), lambda i, h: (i, 0)),
            scratch_shapes=[pltpu.VMEM((tm, D), compute_dtype),  # LN(x) cache
                            pltpu.VMEM((tm, D), jnp.float32)],   # f32 accumulator
        ),
        compiler_params=pltpu.CompilerParams(
            dimension_semantics=("parallel", "arbitrary"),
            vmem_limit_bytes=_vmem_limit_bytes()),
        cost_estimate=cost,
    )(x2d, p["ln2_g"], p["ln2_b"], w1, p["b1"], w2, p["b2"])

    return out2d[:M].reshape(B, S, D)


# ---------------------------------------------------------------------------
# One-time parameter preparation (hoisted out of the per-forward path)
# ---------------------------------------------------------------------------
def prepare_params(layers, *, compute_dtype=jnp.bfloat16):
    """Cast matmul weights to compute_dtype and reshape biases/LN params once."""
    prepped = []
    for p in layers:
        D = p["ln1_g"].shape[0]
        H = p["w1"].shape[1]
        prepped.append(dict(
            ln1_g=p["ln1_g"].reshape(1, D).astype(jnp.float32),
            ln1_b=p["ln1_b"].reshape(1, D).astype(jnp.float32),
            wqkv=p["wqkv"].astype(compute_dtype),
            wo=p["wo"].astype(compute_dtype),
            bo=p["bo"].reshape(1, D).astype(jnp.float32),
            ln2_g=p["ln2_g"].reshape(1, D).astype(jnp.float32),
            ln2_b=p["ln2_b"].reshape(1, D).astype(jnp.float32),
            w1=p["w1"].astype(compute_dtype),
            b1=p["b1"].reshape(1, H).astype(jnp.float32),
            w2=p["w2"].astype(compute_dtype),
            b2=p["b2"].reshape(1, D).astype(jnp.float32),
        ))
    return prepped


def transformer_forward(x, prepared_layers, *, heads, dim_head, tm=512):
    """x: (B, S, dim); prepared_layers: output of prepare_params."""
    for p in prepared_layers:
        x = prenorm_attention(x, p, heads=heads, dim_head=dim_head)
        x = prenorm_ffn(x, p, tm=tm)
    return x


# ---------------------------------------------------------------------------
# Pure-JAX reference (mirrors the PyTorch forward) and deterministic init
# ---------------------------------------------------------------------------
def transformer_ref(x, layers, *, heads, dim_head):
    B, S, D = x.shape
    inner = heads * dim_head
    scale = float(dim_head) ** -0.5
    for p in layers:
        xn = _layernorm(x, p["ln1_g"], p["ln1_b"])
        qkv = xn @ p["wqkv"]
        q, k, v = jnp.split(qkv, 3, axis=-1)
        split = lambda t: t.reshape(B, S, heads, dim_head).transpose(0, 2, 1, 3)
        q, k, v = split(q), split(k), split(v)
        dots = jnp.einsum("bhqd,bhkd->bhqk", q, k) * scale
        attn = jax.nn.softmax(dots, axis=-1)
        o = jnp.einsum("bhqk,bhkd->bhqd", attn, v)
        o = o.transpose(0, 2, 1, 3).reshape(B, S, inner)
        x = o @ p["wo"] + p["bo"] + x
        xn = _layernorm(x, p["ln2_g"], p["ln2_b"])
        hdn = jax.nn.gelu(xn @ p["w1"] + p["b1"], approximate=False)
        x = hdn @ p["w2"] + p["b2"] + x
    return x


def _init_layer(key, dim, heads, dim_head, mlp_dim):
    inner = heads * dim_head
    project_out = not (heads == 1 and dim_head == dim)
    ks = jax.random.split(key, 12)

    def lin(k, fan_in, shape):
        lim = 1.0 / jnp.sqrt(fan_in)
        return jax.random.uniform(k, shape, jnp.float32, -lim, lim)

    p = {
        "ln1_g": jax.random.uniform(ks[0], (dim,), jnp.float32, 0.5, 1.5),
        "ln1_b": jax.random.uniform(ks[1], (dim,), jnp.float32, -0.5, 0.5),
        "wqkv": lin(ks[2], dim, (dim, 3 * inner)),        # to_qkv (bias=False)
        "ln2_g": jax.random.uniform(ks[5], (dim,), jnp.float32, 0.5, 1.5),
        "ln2_b": jax.random.uniform(ks[6], (dim,), jnp.float32, -0.5, 0.5),
        "w1": lin(ks[7], dim, (dim, mlp_dim)),
        "b1": lin(ks[8], dim, (mlp_dim,)),
        "w2": lin(ks[9], mlp_dim, (mlp_dim, dim)),
        "b2": lin(ks[10], mlp_dim, (dim,)),
    }
    if project_out:
        p["wo"] = lin(ks[3], inner, (inner, dim))
        p["bo"] = lin(ks[4], inner, (dim,))
    else:  # to_out == Identity -> identity projection keeps semantics
        p["wo"] = jnp.eye(inner, dtype=jnp.float32)
        p["bo"] = jnp.zeros((dim,), jnp.float32)
    return p


if __name__ == "__main__":
    depth, heads, dim, dim_head, mlp_dim = 2, 4, 32, 8, 64
    B, S = 2, 10   # S=10 pads to 16 inside attention -> exercises the key-mask path

    key = jax.random.PRNGKey(0)
    keys = jax.random.split(key, depth + 1)
    x = jax.random.normal(keys[0], (B, S, dim), dtype=jnp.float32)
    layers = [_init_layer(k, dim, heads, dim_head, mlp_dim) for k in keys[1:]]

    ref = transformer_ref(x, layers, heads=heads, dim_head=dim_head)

    # Exact-precision f32 matmul path.
    out = transformer_forward(x, prepare_params(layers, compute_dtype=jnp.float32),
                              heads=heads, dim_head=dim_head)
    out = jax.block_until_ready(out)
    assert out.shape == (B, S, dim)
    err = float(jnp.max(jnp.abs(out - ref)))
    assert jnp.allclose(out, ref, atol=1e-4, rtol=1e-4), err

    # bf16 MXU operands (default production path), f32 accumulation — loose check.
    out_bf16 = transformer_forward(x, prepare_params(layers),   # bf16 default
                                   heads=heads, dim_head=dim_head)
    out_bf16 = jax.block_until_ready(out_bf16)
    assert jnp.allclose(out_bf16, ref, atol=2.5e-1, rtol=2.5e-1)

    print("KERNEL_OK")
</pallas_src>

<mosaic_0001>
module attributes {stable_mosaic.version = 11 : i64} {
  func.func @_attn_kernel(%arg0: i32, %arg1: memref<1x16x32xf32, #tpu.memory_space<vmem>>, %arg2: memref<1x32xf32, #tpu.memory_space<vmem>>, %arg3: memref<1x32xf32, #tpu.memory_space<vmem>>, %arg4: memref<32x96xf32, #tpu.memory_space<vmem>>, %arg5: memref<32x32xf32, #tpu.memory_space<vmem>>, %arg6: memref<1x32xf32, #tpu.memory_space<vmem>>, %arg7: memref<1x16x32xf32, #tpu.memory_space<vmem>>) attributes {dimension_semantics = [#tpu.dimension_semantics<parallel>], iteration_bounds = array<i64: 2>, scalar_prefetch = 0 : i64, scratch_operands = 0 : i64, tpu.core_type = #tpu.core_type<tc>, window_params = [{transform_indices = @transform_0, window_bounds = array<i64: 1, 16, 32>}, {pipeline_mode = #tpu.pipeline_mode<synchronous>, transform_indices = @transform_1, window_bounds = array<i64: 1, 32>}, {pipeline_mode = #tpu.pipeline_mode<synchronous>, transform_indices = @transform_2, window_bounds = array<i64: 1, 32>}, {pipeline_mode = #tpu.pipeline_mode<synchronous>, transform_indices = @transform_3, window_bounds = array<i64: 32, 96>}, {pipeline_mode = #tpu.pipeline_mode<synchronous>, transform_indices = @transform_4, window_bounds = array<i64: 32, 32>}, {pipeline_mode = #tpu.pipeline_mode<synchronous>, transform_indices = @transform_5, window_bounds = array<i64: 1, 32>}, {transform_indices = @transform_6, window_bounds = array<i64: 1, 16, 32>}]} {
    %c0 = arith.constant 0 : index
    %c0_0 = arith.constant 0 : index
    %c0_1 = arith.constant 0 : index
    %0 = vector.load %arg1[%c0, %c0_0, %c0_1] : memref<1x16x32xf32, #tpu.memory_space<vmem>>, vector<1x16x32xf32>
    %1 = vector.shape_cast %0 : vector<1x16x32xf32> to vector<16x32xf32>
    %c0_2 = arith.constant 0 : index
    %c0_3 = arith.constant 0 : index
    %2 = vector.load %arg2[%c0_2, %c0_3] : memref<1x32xf32, #tpu.memory_space<vmem>>, vector<1x32xf32>
    %c0_4 = arith.constant 0 : index
    %c0_5 = arith.constant 0 : index
    %3 = vector.load %arg3[%c0_4, %c0_5] : memref<1x32xf32, #tpu.memory_space<vmem>>, vector<1x32xf32>
    %cst = arith.constant dense<0.000000e+00> : vector<16xf32>
    %4 = vector.multi_reduction <add>, %1, %cst [1] : vector<16x32xf32> to vector<16xf32>
    %5 = vector.shape_cast %4 : vector<16xf32> to vector<16x1xf32>
    %cst_6 = arith.constant 3.200000e+01 : f32
    %6 = vector.broadcast %cst_6 : f32 to vector<16x1xf32>
    %7 = arith.divf %5, %6 : vector<16x1xf32>
    %8 = vector.broadcast %7 : vector<16x1xf32> to vector<16x32xf32>
    %9 = arith.subf %1, %8 : vector<16x32xf32>
    %10 = arith.mulf %9, %9 : vector<16x32xf32>
    %cst_7 = arith.constant dense<0.000000e+00> : vector<16xf32>
    %11 = vector.multi_reduction <add>, %10, %cst_7 [1] : vector<16x32xf32> to vector<16xf32>
    %12 = vector.shape_cast %11 : vector<16xf32> to vector<16x1xf32>
    %cst_8 = arith.constant 3.200000e+01 : f32
    %13 = vector.broadcast %cst_8 : f32 to vector<16x1xf32>
    %14 = arith.divf %12, %13 : vector<16x1xf32>
    %15 = vector.broadcast %7 : vector<16x1xf32> to vector<16x32xf32>
    %16 = arith.subf %1, %15 : vector<16x32xf32>
    %cst_9 = arith.constant 9.99999974E-6 : f32
    %17 = vector.broadcast %cst_9 : f32 to vector<16x1xf32>
    %18 = arith.addf %14, %17 : vector<16x1xf32>
    %19 = math.rsqrt %18 : vector<16x1xf32>
    %20 = vector.broadcast %19 : vector<16x1xf32> to vector<16x32xf32>
    %21 = arith.mulf %16, %20 : vector<16x32xf32>
    %22 = vector.broadcast %2 : vector<1x32xf32> to vector<16x32xf32>
    %23 = arith.mulf %21, %22 : vector<16x32xf32>
    %24 = vector.broadcast %3 : vector<1x32xf32> to vector<16x32xf32>
    %25 = arith.addf %23, %24 : vector<16x32xf32>
    %c0_10 = arith.constant 0 : index
    %c0_11 = arith.constant 0 : index
    %26 = vector.load %arg4[%c0_10, %c0_11] : memref<32x96xf32, #tpu.memory_space<vmem>>, vector<32x96xf32>
    %cst_12 = arith.constant dense<0.000000e+00> : vector<16x96xf32>
    %27 = tpu.matmul %25, %26, %cst_12 {dimension_numbers = #tpu.dot_dimension_numbers<[1], [0], [0], [1], [0, 0, 1, 1], [], []>} : vector<16x32xf32>, vector<32x96xf32>, vector<16x96xf32> -> vector<16x96xf32>
    %28 = tpu.iota {dimensions = array<i32: 1>} : vector<16x16xi32>
    %c10_i32 = arith.constant 10 : i32
    %29 = vector.broadcast %c10_i32 : i32 to vector<16x16xi32>
    %30 = arith.cmpi slt, %28, %29 : vector<16x16xi32>
    %31 = vector.extract_strided_slice %27 {offsets = [0, 0], sizes = [16, 8], strides = [1, 1]} : vector<16x96xf32> to vector<16x8xf32>
    %32 = vector.extract_strided_slice %27 {offsets = [0, 32], sizes = [16, 8], strides = [1, 1]} : vector<16x96xf32> to vector<16x8xf32>
    %33 = vector.extract_strided_slice %27 {offsets = [0, 64], sizes = [16, 8], strides = [1, 1]} : vector<16x96xf32> to vector<16x8xf32>
    %34 = tpu.transpose %32, [1, 0] : vector<16x8xf32> -> vector<8x16xf32>
    %cst_13 = arith.constant dense<0.000000e+00> : vector<16x16xf32>
    %35 = tpu.matmul %31, %34, %cst_13 {dimension_numbers = #tpu.dot_dimension_numbers<[1], [0], [0], [1], [0, 0, 1, 1], [], []>} : vector<16x8xf32>, vector<8x16xf32>, vector<16x16xf32> -> vector<16x16xf32>
    %cst_14 = arith.constant 0.353553385 : f32
    %36 = vector.broadcast %cst_14 : f32 to vector<16x16xf32>
    %37 = arith.mulf %35, %36 : vector<16x16xf32>
    %cst_15 = arith.constant -1.000000e+30 : f32
    %38 = vector.broadcast %cst_15 : f32 to vector<16x16xf32>
    %39 = arith.select %30, %37, %38 : vector<16x16xi1>, vector<16x16xf32>
    %cst_16 = arith.constant dense<0xFF800000> : vector<16xf32>
    %40 = vector.multi_reduction <maximumf>, %39, %cst_16 [1] : vector<16x16xf32> to vector<16xf32>
    %41 = vector.shape_cast %40 : vector<16xf32> to vector<16x1xf32>
    %42 = vector.broadcast %41 : vector<16x1xf32> to vector<16x16xf32>
    %43 = arith.subf %39, %42 : vector<16x16xf32>
    %44 = math.exp %43 : vector<16x16xf32>
    %cst_17 = arith.constant dense<0.000000e+00> : vector<16xf32>
    %45 = vector.multi_reduction <add>, %44, %cst_17 [1] : vector<16x16xf32> to vector<16xf32>
    %46 = vector.shape_cast %45 : vector<16xf32> to vector<16x1xf32>
    %47 = vector.broadcast %46 : vector<16x1xf32> to vector<16x16xf32>
    %48 = arith.divf %44, %47 : vector<16x16xf32>
    %cst_18 = arith.constant dense<0.000000e+00> : vector<16x8xf32>
    %49 = tpu.matmul %48, %33, %cst_18 {dimension_numbers = #tpu.dot_dimension_numbers<[1], [0], [0], [1], [0, 0, 1, 1], [], []>} : vector<16x16xf32>, vector<16x8xf32>, vector<16x8xf32> -> vector<16x8xf32>
    %50 = vector.extract_strided_slice %27 {offsets = [0, 8], sizes = [16, 8], strides = [1, 1]} : vector<16x96xf32> to vector<16x8xf32>
    %51 = vector.extract_strided_slice %27 {offsets = [0, 40], sizes = [16, 8], strides = [1, 1]} : vector<16x96xf32> to vector<16x8xf32>
    %52 = vector.extract_strided_slice %27 {offsets = [0, 72], sizes = [16, 8], strides = [1, 1]} : vector<16x96xf32> to vector<16x8xf32>
    %53 = tpu.transpose %51, [1, 0] : vector<16x8xf32> -> vector<8x16xf32>
    %cst_19 = arith.constant dense<0.000000e+00> : vector<16x16xf32>
    %54 = tpu.matmul %50, %53, %cst_19 {dimension_numbers = #tpu.dot_dimension_numbers<[1], [0], [0], [1], [0, 0, 1, 1], [], []>} : vector<16x8xf32>, vector<8x16xf32>, vector<16x16xf32> -> vector<16x16xf32>
    %cst_20 = arith.constant 0.353553385 : f32
    %55 = vector.broadcast %cst_20 : f32 to vector<16x16xf32>
    %56 = arith.mulf %54, %55 : vector<16x16xf32>
    %cst_21 = arith.constant -1.000000e+30 : f32
    %57 = vector.broadcast %cst_21 : f32 to vector<16x16xf32>
    %58 = arith.select %30, %56, %57 : vector<16x16xi1>, vector<16x16xf32>
    %cst_22 = arith.constant dense<0xFF800000> : vector<16xf32>
    %59 = vector.multi_reduction <maximumf>, %58, %cst_22 [1] : vector<16x16xf32> to vector<16xf32>
    %60 = vector.shape_cast %59 : vector<16xf32> to vector<16x1xf32>
    %61 = vector.broadcast %60 : vector<16x1xf32> to vector<16x16xf32>
    %62 = arith.subf %58, %61 : vector<16x16xf32>
    %63 = math.exp %62 : vector<16x16xf32>
    %cst_23 = arith.constant dense<0.000000e+00> : vector<16xf32>
    %64 = vector.multi_reduction <add>, %63, %cst_23 [1] : vector<16x16xf32> to vector<16xf32>
    %65 = vector.shape_cast %64 : vector<16xf32> to vector<16x1xf32>
    %66 = vector.broadcast %65 : vector<16x1xf32> to vector<16x16xf32>
    %67 = arith.divf %63, %66 : vector<16x16xf32>
    %cst_24 = arith.constant dense<0.000000e+00> : vector<16x8xf32>
    %68 = tpu.matmul %67, %52, %cst_24 {dimension_numbers = #tpu.dot_dimension_numbers<[1], [0], [0], [1], [0, 0, 1, 1], [], []>} : vector<16x16xf32>, vector<16x8xf32>, vector<16x8xf32> -> vector<16x8xf32>
    %69 = vector.extract_strided_slice %27 {offsets = [0, 16], sizes = [16, 8], strides = [1, 1]} : vector<16x96xf32> to vector<16x8xf32>
    %70 = vector.extract_strided_slice %27 {offsets = [0, 48], sizes = [16, 8], strides = [1, 1]} : vector<16x96xf32> to vector<16x8xf32>
    %71 = vector.extract_strided_slice %27 {offsets = [0, 80], sizes = [16, 8], strides = [1, 1]} : vector<16x96xf32> to vector<16x8xf32>
    %72 = tpu.transpose %70, [1, 0] : vector<16x8xf32> -> vector<8x16xf32>
    %cst_25 = arith.constant dense<0.000000e+00> : vector<16x16xf32>
    %73 = tpu.matmul %69, %72, %cst_25 {dimension_numbers = #tpu.dot_dimension_numbers<[1], [0], [0], [1], [0, 0, 1, 1], [], []>} : vector<16x8xf32>, vector<8x16xf32>, vector<16x16xf32> -> vector<16x16xf32>
    %cst_26 = arith.constant 0.353553385 : f32
    %74 = vector.broadcast %cst_26 : f32 to vector<16x16xf32>
    %75 = arith.mulf %73, %74 : vector<16x16xf32>
    %cst_27 = arith.constant -1.000000e+30 : f32
    %76 = vector.broadcast %cst_27 : f32 to vector<16x16xf32>
    %77 = arith.select %30, %75, %76 : vector<16x16xi1>, vector<16x16xf32>
    %cst_28 = arith.constant dense<0xFF800000> : vector<16xf32>
    %78 = vector.multi_reduction <maximumf>, %77, %cst_28 [1] : vector<16x16xf32> to vector<16xf32>
    %79 = vector.shape_cast %78 : vector<16xf32> to vector<16x1xf32>
    %80 = vector.broadcast %79 : vector<16x1xf32> to vector<16x16xf32>
    %81 = arith.subf %77, %80 : vector<16x16xf32>
    %82 = math.exp %81 : vector<16x16xf32>
    %cst_29 = arith.constant dense<0.000000e+00> : vector<16xf32>
    %83 = vector.multi_reduction <add>, %82, %cst_29 [1] : vector<16x16xf32> to vector<16xf32>
    %84 = vector.shape_cast %83 : vector<16xf32> to vector<16x1xf32>
    %85 = vector.broadcast %84 : vector<16x1xf32> to vector<16x16xf32>
    %86 = arith.divf %82, %85 : vector<16x16xf32>
    %cst_30 = arith.constant dense<0.000000e+00> : vector<16x8xf32>
    %87 = tpu.matmul %86, %71, %cst_30 {dimension_numbers = #tpu.dot_dimension_numbers<[1], [0], [0], [1], [0, 0, 1, 1], [], []>} : vector<16x16xf32>, vector<16x8xf32>, vector<16x8xf32> -> vector<16x8xf32>
    %88 = vector.extract_strided_slice %27 {offsets = [0, 24], sizes = [16, 8], strides = [1, 1]} : vector<16x96xf32> to vector<16x8xf32>
    %89 = vector.extract_strided_slice %27 {offsets = [0, 56], sizes = [16, 8], strides = [1, 1]} : vector<16x96xf32> to vector<16x8xf32>
    %90 = vector.extract_strided_slice %27 {offsets = [0, 88], sizes = [16, 8], strides = [1, 1]} : vector<16x96xf32> to vector<16x8xf32>
    %91 = tpu.transpose %89, [1, 0] : vector<16x8xf32> -> vector<8x16xf32>
    %cst_31 = arith.constant dense<0.000000e+00> : vector<16x16xf32>
    %92 = tpu.matmul %88, %91, %cst_31 {dimension_numbers = #tpu.dot_dimension_numbers<[1], [0], [0], [1], [0, 0, 1, 1], [], []>} : vector<16x8xf32>, vector<8x16xf32>, vector<16x16xf32> -> vector<16x16xf32>
    %cst_32 = arith.constant 0.353553385 : f32
    %93 = vector.broadcast %cst_32 : f32 to vector<16x16xf32>
    %94 = arith.mulf %92, %93 : vector<16x16xf32>
    %cst_33 = arith.constant -1.000000e+30 : f32
    %95 = vector.broadcast %cst_33 : f32 to vector<16x16xf32>
    %96 = arith.select %30, %94, %95 : vector<16x16xi1>, vector<16x16xf32>
    %cst_34 = arith.constant dense<0xFF800000> : vector<16xf32>
    %97 = vector.multi_reduction <maximumf>, %96, %cst_34 [1] : vector<16x16xf32> to vector<16xf32>
    %98 = vector.shape_cast %97 : vector<16xf32> to vector<16x1xf32>
    %99 = vector.broadcast %98 : vector<16x1xf32> to vector<16x16xf32>
    %100 = arith.subf %96, %99 : vector<16x16xf32>
    %101 = math.exp %100 : vector<16x16xf32>
    %cst_35 = arith.constant dense<0.000000e+00> : vector<16xf32>
    %102 = vector.multi_reduction <add>, %101, %cst_35 [1] : vector<16x16xf32> to vector<16xf32>
    %103 = vector.shape_cast %102 : vector<16xf32> to vector<16x1xf32>
    %104 = vector.broadcast %103 : vector<16x1xf32> to vector<16x16xf32>
    %105 = arith.divf %101, %104 : vector<16x16xf32>
    %cst_36 = arith.constant dense<0.000000e+00> : vector<16x8xf32>
    %106 = tpu.matmul %105, %90, %cst_36 {dimension_numbers = #tpu.dot_dimension_numbers<[1], [0], [0], [1], [0, 0, 1, 1], [], []>} : vector<16x16xf32>, vector<16x8xf32>, vector<16x8xf32> -> vector<16x8xf32>
    %107 = tpu.concatenate %49, %68, %87, %106 in 1 : vector<16x8xf32>, vector<16x8xf32>, vector<16x8xf32>, vector<16x8xf32> -> vector<16x32xf32>
    %c0_37 = arith.constant 0 : index
    %c0_38 = arith.constant 0 : index
    %108 = vector.load %arg5[%c0_37, %c0_38] : memref<32x32xf32, #tpu.memory_space<vmem>>, vector<32x32xf32>
    %cst_39 = arith.constant dense<0.000000e+00> : vector<16x32xf32>
    %109 = tpu.matmul %107, %108, %cst_39 {dimension_numbers = #tpu.dot_dimension_numbers<[1], [0], [0], [1], [0, 0, 1, 1], [], []>} : vector<16x32xf32>, vector<32x32xf32>, vector<16x32xf32> -> vector<16x32xf32>
    %110 = arith.addf %1, %109 : vector<16x32xf32>
    %c0_40 = arith.constant 0 : index
    %c0_41 = arith.constant 0 : index
    %111 = vector.load %arg6[%c0_40, %c0_41] : memref<1x32xf32, #tpu.memory_space<vmem>>, vector<1x32xf32>
    %112 = vector.broadcast %111 : vector<1x32xf32> to vector<16x32xf32>
    %113 = arith.addf %110, %112 : vector<16x32xf32>
    %c0_42 = arith.constant 0 : index
    %c0_43 = arith.constant 0 : index
    %c0_44 = arith.constant 0 : index
    %114 = vector.load %arg7[%c0_42, %c0_43, %c0_44] : memref<1x16x32xf32, #tpu.memory_space<vmem>>, vector<1x16x32xf32>
    %115 = vector.shape_cast %114 : vector<1x16x32xf32> to vector<16x32xf32>
    %116 = vector.shape_cast %113 : vector<16x32xf32> to vector<1x16x32xf32>
    tpu.vector_store %arg7[%c0_42, %c0_43, %c0_44], %116 {strides = array<i32>} : memref<1x16x32xf32, #tpu.memory_space<vmem>>, vector<1x16x32xf32>,
    return
  }
  func.func @transform_0(%arg0: i32) -> (i32, i32, i32) {
    %c0_i32 = arith.constant 0 : i32
    %c0_i32_0 = arith.constant 0 : i32
    %c0_i32_1 = arith.constant 0 : i32
    return %arg0, %c0_i32, %c0_i32_0 : i32, i32, i32
  }
  func.func @transform_1(%arg0: i32) -> (i32, i32) {
    %c0_i32 = arith.constant 0 : i32
    %c0_i32_0 = arith.constant 0 : i32
    %c0_i32_1 = arith.constant 0 : i32
    return %c0_i32, %c0_i32_0 : i32, i32
  }
  func.func @transform_2(%arg0: i32) -> (i32, i32) {
    %c0_i32 = arith.constant 0 : i32
    %c0_i32_0 = arith.constant 0 : i32
    %c0_i32_1 = arith.constant 0 : i32
    return %c0_i32, %c0_i32_0 : i32, i32
  }
  func.func @transform_3(%arg0: i32) -> (i32, i32) {
    %c0_i32 = arith.constant 0 : i32
    %c0_i32_0 = arith.constant 0 : i32
    %c0_i32_1 = arith.constant 0 : i32
    return %c0_i32, %c0_i32_0 : i32, i32
  }
  func.func @transform_4(%arg0: i32) -> (i32, i32) {
    %c0_i32 = arith.constant 0 : i32
    %c0_i32_0 = arith.constant 0 : i32
    %c0_i32_1 = arith.constant 0 : i32
    return %c0_i32, %c0_i32_0 : i32, i32
  }
  func.func @transform_5(%arg0: i32) -> (i32, i32) {
    %c0_i32 = arith.constant 0 : i32
    %c0_i32_0 = arith.constant 0 : i32
    %c0_i32_1 = arith.constant 0 : i32
    return %c0_i32, %c0_i32_0 : i32, i32
  }
  func.func @transform_6(%arg0: i32) -> (i32, i32, i32) {
    %c0_i32 = arith.constant 0 : i32
    %c0_i32_0 = arith.constant 0 : i32
    %c0_i32_1 = arith.constant 0 : i32
    return %arg0, %c0_i32, %c0_i32_0 : i32, i32, i32
  }
}

</mosaic_0001>

<bundles_post_ra>
// kernel: tpu_custom_call.1
= control target key start
LH: loop header
LB: loop body
LE: loop exit
PB: predicated region body
PF: predicated region fallthrough
CT: control target
= control target key end

     0   :  { %11 = vsyncpa [#allocation3], 0  ;;  %s2329_s0 = inlined_call_operand.hbm [shape: f32[2,16,32], index: 0, kind: input, shape index: {}]   ;;  %s2330_s1 = inlined_call_operand.vmem [shape: f32[1,32], index: 1, kind: input, shape index: {}]   ;;  %s2331_s2 = inlined_call_operand.vmem [shape: f32[1,32], index: 2, kind: input, shape index: {}]   ;;  %s2332_s3 = inlined_call_operand.hbm [shape: f32[32,96], index: 3, kind: input, shape index: {}]   ;;  %s2333_s4 = inlined_call_operand.hbm [shape: f32[32,32], index: 4, kind: input, shape index: {}]   ;;  %s2334_s5 = inlined_call_operand.vmem [shape: f32[1,32], index: 5, kind: input, shape index: {}]   ;;  %s2335_s6 = inlined_call_operand.hbm [shape: f32[2,16,32], index: 6, kind: output, shape index: {}]  }
   0x1   :  { %13 = vsyncpa [#allocation3 + $0x1], 0 }
   0x2   :  { %14 = vsyncpa [#allocation6], 0 }
   0x3   :  { %15 = vsyncpa [#allocation4], 0 }
   0x4   :  { %17 = vsyncpa [#allocation4 + $0x1], 0  ;;  %s1985_s21 = smov 0   ;;  %s1987_s22 = smov 0  }
   0x5   :  { %s1989_s23 = smov 0   ;;  %s1991_s24 = smov 0  }
   0x6 LB: > { %s2006_s25 = sadd.s32 4294967295, %s1927_s24   ;;  %s1486_s26 = sadd.s32 4294967294, %s1927_s24   ;;  %s1927_s24 = sphi %s1991_s24, %s2360_s24   ;;  %s1923_s23 = sphi %s1989_s23, %s2359_s23   ;;  %s1919_s22 = sphi %s1987_s22, %s2358_s22   ;;  %s1915_s21 = sphi %s1985_s21, %s2357_s21  }
   0x7   : > { %p43_p0 = scmp.ne.s32.totalorder %s1919_s22, %s1915_s21  ;;  %p2336_p1 = scmp.eq.s32.totalorder %s2006_s25, 0 }
   0x8   : > { %p172_p2 = scmp.eq.s32.totalorder %s2006_s25, 1  ;;  %p178_p3 = scmp.eq.s32.totalorder %s1486_s26, 1 }
   0x9   : > { %p2015_p4 = por %p2336_p1, %p43_p0  ;;  %p1487_p5 = scmp.ge.s32.totalorder %s1927_s24, 1 }
   0xa   : > { %p2020_p6 = por %p178_p3, %p43_p0  ;;  %p185_p7 = scmp.lt.s32.totalorder %s1927_s24, 3 }
   0xb   : > { %s2342_s27 = scalar_select %p2015_p4, 1, 0 }
   0xc   : > { %s2343_s28 = scalar_select %p2020_p6, 1, 0 }
   0xd   : > { %p2025_p8 = pnand %p1487_p5, %p185_p7  ;;  %s1929_s30 = smov [#allocation5]  }
   0xe   : > { %s203_s7 = sshll.u32 %s1929_s30, 4  ;;  %s1930_s9 = smov [#allocation7]   ;;  %s204_s7 = int_to_ptr.vmem [resolvable:$true] %s203_s7 }
   0xf   : > { %s2344_s29 = scalar_select %p2025_p8, 1, 0 }
  0x10   : > { %p1671_p9 = pneg %p2025_p8  ;;  %s216_s10 = sshll.u32 %s1930_s9, 4  ;;  %s217_s10 = int_to_ptr.vmem [resolvable:$true] %s216_s10 }
  0x11   : > { %s1790_s11 = scalar_lea.vmem %s204_s7, 512  ;;  %p1798_p5 = scmp.lt.s32.totalorder %s204_s7, %s204_s7 }
  0x12   : > { %p2034_p11 = pnand %p1671_p9, %p2336_p1  ;;  %p1791_p13 = scmp.ne.s32.totalorder %s204_s7, %s1790_s11 }
  0x13   : > { %p1799_p7 = scmp.lt.s32.totalorder %s1790_s11, %s1790_s11 }
  0x14   : > { %p1781_p12 = pneg %p2034_p11 }
  0x15   : > { %p1800_p10 = por %p1799_p7, %p1798_p5 }
  0x16   : > { %p1793_p0 = pnand %p1791_p13, %p1781_p12 }
  0x18   : > { %p1794_p3 = pneg %p1793_p0 }
  0x1a   : > { %p1801_p9 = pnand %p1800_p10, %p1794_p3 }
  0x1c   : > { %1804 = shalt.err (!%p1801_p9)
}
  0x1d   : > { %s2337_s12 = smov 128   ;;  %s2338_s13 = smov 8  }
  0x1e   : > { %1674 = dma.hbm_to_vmem [thread:$0]  (!%p2034_p11), %s2332_s3, 512, %s204_s7, [#allocation6], %s2337_s12, %s2337_s12, %s2338_s13  }
  0x1f   : > { %s1816_s16 = scalar_lea.vmem %s217_s10, 512  ;;  %p1824_p10 = scmp.lt.s32.totalorder %s217_s10, %s217_s10 }
  0x20   : > { %p1817_p13 = scmp.ne.s32.totalorder %s217_s10, %s1816_s16  ;;  %p1825_p3 = scmp.lt.s32.totalorder %s1816_s16, %s1816_s16 }
  0x22   : > { %p1819_p0 = pnand %p1817_p13, %p1781_p12  ;;  %p1826_p7 = por %p1825_p3, %p1824_p10 }
  0x24   : > { %p1820_p5 = pneg %p1819_p0 }
  0x26   : > { %p1827_p9 = pnand %p1826_p7, %p1820_p5 }
  0x28   : > { %1830 = shalt.err (!%p1827_p9)
}
  0x29   : > { %1677 = dma.hbm_to_vmem [thread:$0]  (!%p2034_p11), %s2333_s4, 512, %s217_s10, [#allocation6], %s2337_s12, %s2337_s12, %s2338_s13  }
  0x2a   : > { %s2063_s19 = sadd.s32 1, %s1927_s24   ;;  %s30_s20 = sadd.s32 1, %s1923_s23 }
  0x2b   : > { %s27_s26 = ssub.s32 %s1927_s24, %s2063_s19  ;;  %p37_p12 = scmp.ne.s32.totalorder %s1923_s23, %s1919_s22 }
  0x2c   : > { %p28_p13 = scmp.eq.s32.totalorder %s27_s26, 0  ;;  %p38_p0 = scmp.eq.s32.totalorder %s1927_s24, 0 }
  0x2d   : > { %p2073_p5 = por %p172_p2, %p37_p12  ;;  %p1688_p10 = scmp.lt.s32.totalorder %s1927_s24, 2 }
  0x2e   : > { %s2079_s7 = scalar_select %p28_p13, %s1923_s23, %s30_s20  }
  0x2f   : > { %s2346_s30 = scalar_select %p2073_p5, 1, 0 }
  0x30   : > { %p39_p3 = por %p38_p0, %p37_p12  ;;  %s233_s8 = sand.u32 1, %s1923_s23  }
  0x31   : > { %s1491_s9 = sshll.u32 %s233_s8, 4  ;;  %s1535_s10 = sshll.u32 %s1927_s24, 8 }
  0x32   : > { %s2086_s15 = scalar_lea.hbm %s2329_s0, %s1535_s10  ;;  %s237_s16 = scalar_lea.vmem [#allocation2], %s1491_s9 }
  0x33   : > { %s244_s17 = sshll.u32 %s237_s16, 4  ;;  %p2090_p2 = pnand %p1688_p10, %p39_p3  ;;  %s2088_s17 = int_to_ptr.vmem [resolvable:$true] %s244_s17 }
  0x34   : > { %s2094_s20 = scalar_lea.sflag [#allocation3], %s233_s8  ;;  %s1831_s26 = scalar_lea.hbm %s2086_s15, 256 }
  0x35   : > { %p1832_p11 = scmp.ne.s32.totalorder %s2086_s15, %s1831_s26  ;;  %p1833_p7 = pneg %p2090_p2 }
  0x36   : > { %s1836_s9 = scalar_lea.hbm %s2329_s0, 512  ;;  %p1837_p13 = scmp.lt.s32.totalorder %s2086_s15, %s2329_s0 }
  0x37   : > { %p1834_p9 = pnand %p1833_p7, %p1832_p11  ;;  %p1838_p0 = scmp.lt.s32.totalorder %s1836_s9, %s1831_s26 }
  0x39   : > { %p1835_p12 = pneg %p1834_p9  ;;  %p1839_p10 = por %p1838_p0, %p1837_p13 }
  0x3b   : > { %p1840_p3 = pnand %p1839_p10, %p1835_p12 }
  0x3d   : > { %1843 = shalt.err (!%p1840_p3)
}
  0x3e   : > { %s1844_s8 = scalar_lea.vmem %s2088_s17, 256  ;;  %s1933_s12 = smov [#allocation2]  }
  0x3f   : > { %p1845_p1 = scmp.ne.s32.totalorder %s2088_s17, %s1844_s8  ;;  %s1849_s13 = sshll.u32 %s1933_s12, 4  ;;  %s1850_s13 = int_to_ptr.vmem [resolvable:$false] %s1849_s13 }
  0x40   : > { %s1851_s10 = scalar_lea.vmem %s1850_s13, 512  ;;  %p1852_p9 = scmp.lt.s32.totalorder %s2088_s17, %s1850_s13 }
  0x41   : > { %p1847_p6 = pnand %p1845_p1, %p1833_p7  ;;  %p1853_p5 = scmp.lt.s32.totalorder %s1851_s10, %s1844_s8 }
  0x43   : > { %p1848_p11 = pneg %p1847_p6  ;;  %p1854_p4 = por %p1853_p5, %p1852_p9 }
  0x45   : > { %p1855_p8 = pnand %p1854_p4, %p1848_p11 }
  0x47   : > { %1858 = shalt.err (!%p1855_p8)
}
  0x48   : > { %s2348_s26 = smov 8   ;;  %s2349_s11 = smov 128  }
  0x49   : > { %1681 = dma.hbm_to_vmem [thread:$0]  (!%p2090_p2), %s2086_s15, 256, %s2088_s17, %s2094_s20, %s2349_s11, %s2349_s11, %s2348_s26  }
  0x4a   : > { %p2350_p1 = scmp.ne.s32.totalorder %s2344_s29, 0 }
  0x4b   : > { %s2121_s12 = sand.u32 (!%p2350_p1), 1, %s1919_s22   ;;  %p2351_p4 = scmp.ne.s32.totalorder (!%p2350_p1), %s2342_s27, 0 }
  0x4c   : > { %256 = sbr.rel (%p2350_p1) target bundleno = 3313 (0xcf1), region = 44  ;;  %s1495_s13 = sshll.u32 (!%p2350_p1), %s2121_s12, 4 }
  0x4d   : > { %s259_s9 = scalar_lea.sflag (!%p2350_p1), [#allocation3], %s2121_s12  ;;  %s262_s18 = scalar_lea.vmem (!%p2350_p1), [#allocation2], %s1495_s13 }
  0x51   : > { %1902 = dma.done.wait (%p2351_p4), %s259_s9, 256  }
  0x52   : > { %1904 = vsyncadd (%p2351_p4), %s259_s9, 4294967040  ;;  %p2352_p6 = scmp.eq.s32.totalorder %s2006_s25, 0 }
  0x54   : > { %1906 = dma.done.wait (%p2352_p6), [#allocation6], 1024   ;;  %p2353_p8 = pmov %p2352_p6 }
  0x55   : > { %vm303_vm0 = vcmask 261120   ;;  %v2135_v0 = vld [vmem:[%s262_s18] sm:$0xff]  ;;  %v2137_v1 = vld [vmem:[%s262_s18 + $0x8] sm:$0xff]  ;;  %vm441_vm1 = vcmask 64512   ;;  %s1934_s20 = smov 96   ;;  %v432_v38 = vlaneseq  ;;  %vm529_vm3 = vcmask 130048  }
  0x56   : > { %1908 = vsyncadd (%p2353_p8), [#allocation6], 4294966272  ;;  %v304_v2 = vsel %vm303_vm0, %v2135_v0, 0.0  ;;  %v307_v3 = vsel %vm303_vm0, %v2137_v1, 0.0  ;;  %v350_v14 = vld [vmem:[#allocation5 + $0x18] sm:$0xff]  ;;  %v349_v15 = vld [vmem:[#allocation5 + $0x10] sm:$0xff] }
  0x57   : > { %305 = vadd.xlane.f32.xlu0 %v304_v2  ;;  %1581 = vmatprep.subr.mxu0 %v350_v14  ;;  %v348_v16 = vld [vmem:[#allocation5 + $0x8] sm:$0xff]  ;;  %v347_v17 = vld [vmem:[#allocation5] sm:$0xff]  ;;  %v2169_v39 = vand.u32 127, %v432_v38  ;;  %s1935_s14 = smov 64   ;;  %s1936_s16 = smov 88   ;;  %vm1279_vm4 = vcmask 195584  }
  0x58   : > { %1582 = vmatpush3.msra.mxu0 %v350_v14  ;;  %v1499_v25 = vld [vmem:[%s2330_s1] ss:$0 sm:$0xff]  ;;  %s1937_s8 = smov 120   ;;  %s1938_s10 = smov 56  }
  0x59   : > { %1583 = vmatprep.subr.mxu0 %v349_v15  ;;  %v1500_v27 = vld [vmem:[%s2331_s2] ss:$0 sm:$0xff]  ;;  %vm434_vm2 = vcmp.lt.s32.totalorder %v2169_v39, 10  ;;  %s1939_s26 = smov 80   ;;  %s1940_s11 = smov 112  }
  0x5a   : > { %1584 = vmatpush3.msra.mxu0 %v349_v15  ;;  %s1941_s9 = smov 48   ;;  %s1942_s18 = smov 72  }
  0x5b   : > { %308 = vadd.xlane.f32.xlu0 %v307_v3  ;;  %1585 = vmatprep.subr.mxu0 %v348_v16  ;;  %s1943_s27 = smov 104   ;;  %s1944_s29 = smov 40  }
  0x5c   : > { %1586 = vmatpush3.msra.mxu0 %v348_v16  ;;  %s1945_s15 = smov 8   ;;  %s1946_s17 = smov 16  }
  0x5d   : > { %1587 = vmatprep.subr.mxu0 %v347_v17  ;;  %p2354_p2 = scmp.ne.s32.totalorder %s2346_s30, 0 }
  0x5e   : > { %1588 = vmatpush3.msra.mxu0 %v347_v17 }
  0xe0   : > { %v306_v4 = vpop.xlane.xlu0 %305 }
  0xe1   : > { %v311_v5 = vmul.f32 0.03125, %v306_v4 }
  0xe3   : > { %v313_v6 = vsub.f32 %v2135_v0, %v311_v5 }
  0xe4   : > { %v309_v7 = vpop.xlane.xlu0 %308 }
  0xe5   : > { %v312_v8 = vmul.f32 0.03125, %v309_v7  ;;  %v315_v9 = vmul.f32 %v313_v6, %v313_v6 }
  0xe7   : > { %v314_v10 = vsub.f32 %v2137_v1, %v312_v8  ;;  %v317_v11 = vsel %vm303_vm0, %v315_v9, 0.0 }
  0xe8   : > { %318 = vadd.xlane.f32.xlu1 %v317_v11 }
  0xe9   : > { %v316_v12 = vmul.f32 %v314_v10, %v314_v10 }
  0xeb   : > { %v320_v13 = vsel %vm303_vm0, %v316_v12, 0.0 }
  0xec   : > { %321 = vadd.xlane.f32.xlu1 %v320_v13 }
 0x171   : > { %v319_v18 = vpop.xlane.xlu1 %318 }
 0x172   : > { %v323_v19 = vmul.f32 0.03125, %v319_v18 }
 0x174   : > { %v325_v20 = vadd.f32 1e-05, %v323_v19 }
 0x175   : > { %v322_v21 = vpop.xlane.xlu1 %321 }
 0x176   : > { %1743 = vrsqrt.f32 %v325_v20  ;;  %v324_v22 = vmul.f32 0.03125, %v322_v21 }
 0x178   : > { %v326_v23 = vadd.f32 1e-05, %v324_v22 }
 0x17a   : > { %1745 = vrsqrt.f32 %v326_v23 }
 0x183   : > { %v1744_v24 = vpop.eup %1743 }
 0x184   : > { %v329_v26 = vmul.f32 %v1744_v24, %v313_v6 }
 0x186   : > { %v337_v28 = vmul.f32 %v1499_v25, %v329_v26 }
 0x187   : > { %v1746_v29 = vpop.eup %1745 }
 0x188   : > { %v330_v30 = vmul.f32 %v1746_v29, %v314_v10  ;;  %v345_v31 = vadd.f32 %v1500_v27, %v337_v28 }
 0x18a   : > { %v338_v32 = vmul.f32 %v1499_v25, %v330_v30  ;;  %1589 = vmatprep.mubr.msk.f32.mxu0 %vm303_vm0, %v345_v31 }
 0x18c   : > { %v346_v33 = vadd.f32 %v1500_v27, %v338_v32 }
 0x18e   : > { %1590 = vmatmul.mubr.msk.f32.vlgmr.msra.gmra.mxu0 %vm303_vm0, %v346_v33 }
 0x24e   : > { %v2155_v34 = vpop.f32.mrf.mxu0 }
 0x24f   : > { %439 = vrot.lane.b32.xlu0 %v2155_v34, %s1934_s20 }
 0x250   : > { %v2158_v35 = vpop.f32.mrf.mxu0 }
 0x251   : > { %437 = vrot.lane.b32.xlu1 %v2158_v35, %s1934_s20  ;;  %1596 = vmatprep.mubr.msk.f32.mxu1 %vm441_vm1, %v2158_v35  ;;  %s1947_s20 = smov 24  }
 0x2c1   : > { %v440_v36 = vpop.permute.xlu0 %439 }
 0x2c2   : > { %1592 = vmatprep.subr.msk.mxu1 %vm441_vm1, %v440_v36 }
 0x2c3   : > { %1593 = vmatpush3.xpose.msk.msra.mxu1 %vm441_vm1, %v440_v36  ;;  %v438_v37 = vpop.permute.xlu1 %437 }
 0x2c4   : > { %1594 = vmatprep.subr.msk.mxu1 %vm441_vm1, %v438_v37 }
 0x2c7   : > { %1595 = vmatpush3.xpose.msk.msra.mxu1 %vm441_vm1, %v438_v37 }
 0x2ca   : > { %1597 = vmatmul.mubr.msk.f32.vlgmr.msra.gmra.mxu1 %vm441_vm1, %v2155_v34 }
 0x38a   : > { %v1598_v40 = vpop.f32.mrf.mxu1 }
 0x38b   : > { %v526_v41 = vmul.f32 0.35355338, %v1598_v40 }
 0x38c   : > { %v516_v42 = vpop.f32.mrf.mxu1 }
 0x38d   : > { %v525_v43 = vmul.f32 0.35355338, %v516_v42  ;;  %v528_v44 = vsel %vm434_vm2, %v526_v41, -1e+30 }
 0x38e   : > { %v533_v45 = vsel %vm529_vm3, %v528_v44, -inf }
 0x38f   : > { %534 = vmax.xlane.f32.xlu0 %v533_v45  ;;  %v527_v46 = vsel %vm434_vm2, %v525_v43, -1e+30 }
 0x390   : > { %v530_v47 = vsel %vm529_vm3, %v527_v46, -inf }
 0x391   : > { %531 = vmax.xlane.f32.xlu1 %v530_v47 }
 0x418   : > { %v535_v48 = vpop.xlane.xlu0 %534 }
 0x419   : > { %v537_v49 = vsub.f32 %v528_v44, %v535_v48 }
 0x41a   : > { %v532_v50 = vpop.xlane.xlu1 %531 }
 0x41b   : > { %v540_v51 = vmul.f32 1.442695, %v537_v49  ;;  %v536_v52 = vsub.f32 %v527_v46, %v532_v50 }
 0x41d   : > { %1747 = vpow2.f32 %v540_v51  ;;  %v538_v53 = vmul.f32 1.442695, %v536_v52 }
 0x41f   : > { %1749 = vpow2.f32 %v538_v53 }
 0x42a   : > { %v1748_v54 = vpop.eup %1747 }
 0x42b   : > { %v545_v55 = vsel %vm529_vm3, %v1748_v54, 0.0 }
 0x42c   : > { %v1750_v56 = vpop.eup %1749  ;;  %546 = vadd.xlane.f32.xlu1 %v545_v55 }
 0x42d   : > { %v542_v57 = vsel %vm529_vm3, %v1750_v56, 0.0 }
 0x42e   : > { %543 = vadd.xlane.f32.xlu0 %v542_v57 }
 0x43d   : > { %552 = vrot.lane.b32.xlu1 %v2158_v35, %s1935_s14 }
 0x441   : > { %645 = vrot.lane.b32.xlu1 %v2155_v34, %s1936_s16 }
 0x444   : > { %554 = vrot.lane.b32.xlu0 %v2155_v34, %s1935_s14 }
 0x445   : > { %643 = vrot.lane.b32.xlu1 %v2158_v35, %s1936_s16 }
 0x448   : > { %639 = vrot.lane.b32.xlu0 %v2158_v35, %s1937_s8 }
 0x449   : > { %641 = vrot.lane.b32.xlu1 %v2155_v34, %s1937_s8  ;;  %s1536_s8 = sshll.u32 %s2006_s25, 8  ;;  %s1381_s25 = scalar_lea.sflag [#allocation4], %s2121_s12 }
 0x4b5   : > { %v547_v58 = vpop.xlane.xlu1 %546 }
 0x4b6   : > { %1751 = vrcp.f32 %v547_v58 }
 0x4b7   : > { %v544_v59 = vpop.xlane.xlu0 %543 }
 0x4b8   : > { %1753 = vrcp.f32 %v544_v59 }
 0x4b9   : > { %v553_v60 = vpop.permute.xlu1 %552 }
 0x4bb   : > { %v555_v61 = vpop.permute.xlu0 %554 }
 0x4bc   : > { %1599 = vmatprep.subr.mxu1 %v555_v61 }
 0x4bd   : > { %1600 = vmatpush3.msra.mxu1 %v555_v61  ;;  %v646_v62 = vpop.permute.xlu1 %645 }
 0x4be   : > { %1601 = vmatprep.subr.mxu1 %v553_v60 }
 0x4bf   : > { %1602 = vmatpush3.msra.mxu1 %v553_v60  ;;  %v640_v5 = vpop.permute.xlu0 %639 }
 0x4c0   : > { %1606 = vmatprep.subr.msk.mxu1 %vm441_vm1, %v646_v62 }
 0x4c1   : > { %v644_v6 = vpop.permute.xlu1 %643 }
 0x4c3   : > { %v1752_v63 = vpop.eup %1751 }
 0x4c4   : > { %v551_v4 = vmul.f32 %v1752_v63, %v1748_v54 }
 0x4c5   : > { %v1754_v2 = vpop.eup %1753  ;;  %v642_v7 = vpop.permute.xlu1 %641 }
 0x4c6   : > { %v549_v3 = vmul.f32 %v1754_v2, %v1750_v56 }
 0x4c8   : > { %1603 = vmatprep.mubr.msk.f32.mxu1 %vm529_vm3, %v549_v3 }
 0x4c9   : > { %1604 = vmatmul.mubr.msk.f32.vlgmr.msra.gmra.mxu1 %vm529_vm3, %v551_v4 }
 0x4ca   : > { %1607 = vmatpush3.xpose.msk.msra.mxu1 %vm441_vm1, %v646_v62  ;;  %1610 = vmatprep.mubr.msk.f32.mxu1 %vm441_vm1, %v640_v5 }
 0x4cb   : > { %1608 = vmatprep.subr.msk.mxu1 %vm441_vm1, %v644_v6 }
 0x4ce   : > { %1609 = vmatpush3.xpose.msk.msra.mxu1 %vm441_vm1, %v644_v6 }
 0x4d1   : > { %1611 = vmatmul.mubr.msk.f32.vlgmr.msra.gmra.mxu1 %vm441_vm1, %v642_v7 }
 0x589   : > { %v2194_v8 = vpop.f32.mrf.mxu1 }
 0x58b   : > { %v2196_v9 = vpop.f32.mrf.mxu1 }
 0x591   : > { %v1612_v10 = vpop.f32.mrf.mxu1 }
 0x592   : > { %v731_v11 = vmul.f32 0.35355338, %v1612_v10 }
 0x593   : > { %v721_v12 = vpop.f32.mrf.mxu1 }
 0x594   : > { %v730_v13 = vmul.f32 0.35355338, %v721_v12  ;;  %v733_v14 = vsel %vm434_vm2, %v731_v11, -1e+30 }
 0x595   : > { %v737_v15 = vsel %vm529_vm3, %v733_v14, -inf }
 0x596   : > { %738 = vmax.xlane.f32.xlu1 %v737_v15  ;;  %v732_v16 = vsel %vm434_vm2, %v730_v13, -1e+30 }
 0x597   : > { %v734_v17 = vsel %vm529_vm3, %v732_v16, -inf }
 0x598   : > { %735 = vmax.xlane.f32.xlu0 %v734_v17 }
 0x5a7   : > { %756 = vrot.lane.b32.xlu1 %v2158_v35, %s1938_s10 }
 0x5ab   : > { %849 = vrot.lane.b32.xlu1 %v2155_v34, %s1939_s26 }
 0x5af   : > { %847 = vrot.lane.b32.xlu1 %v2158_v35, %s1939_s26 }
 0x5b3   : > { %845 = vrot.lane.b32.xlu1 %v2155_v34, %s1940_s11 }
 0x61f   : > { %v739_v18 = vpop.xlane.xlu1 %738 }
 0x620   : > { %v741_v19 = vsub.f32 %v733_v14, %v739_v18 }
 0x621   : > { %v736_v20 = vpop.xlane.xlu0 %735 }
 0x622   : > { %v744_v21 = vmul.f32 1.442695, %v741_v19  ;;  %v740_v22 = vsub.f32 %v732_v16, %v736_v20 }
 0x623   : > { %v757_v30 = vpop.permute.xlu1 %756 }
 0x624   : > { %1755 = vpow2.f32 %v744_v21  ;;  %v742_v23 = vmul.f32 1.442695, %v740_v22 }
 0x626   : > { %1757 = vpow2.f32 %v742_v23 }
 0x627   : > { %v850_v32 = vpop.permute.xlu1 %849 }
 0x62b   : > { %v848_v41 = vpop.permute.xlu1 %847 }
 0x62f   : > { %v846_v42 = vpop.permute.xlu1 %845 }
 0x631   : > { %v1756_v24 = vpop.eup %1755 }
 0x632   : > { %v749_v25 = vsel %vm529_vm3, %v1756_v24, 0.0 }
 0x633   : > { %v1758_v26 = vpop.eup %1757  ;;  %750 = vadd.xlane.f32.xlu0 %v749_v25 }
 0x634   : > { %v746_v27 = vsel %vm529_vm3, %v1758_v26, 0.0 }
 0x637   : > { %747 = vadd.xlane.f32.xlu0 %v746_v27 }
 0x64d   : > { %758 = vrot.lane.b32.xlu0 %v2155_v34, %s1938_s10  ;;  %s298_s10 = scalar_lea.vmem [#allocation8], %s1495_s13 }
 0x64e   : > { %s1394_s26 = sshll.u32 %s298_s10, 4  ;;  %s2284_s26 = int_to_ptr.vmem [resolvable:$true] %s1394_s26 }
 0x64f   : > { %s1859_s13 = scalar_lea.vmem %s2284_s26, 256 }
 0x650   : > { %p1860_p5 = scmp.ne.s32.totalorder %s2284_s26, %s1859_s13 }
 0x651   : > { %843 = vrot.lane.b32.xlu0 %v2158_v35, %s1940_s11 }
 0x652   : > { %p1861_p7 = pnand %p1860_p5, %p2354_p2 }
 0x654   : > { %p1862_p12 = pneg %p1861_p7 }
 0x6bc   : > { %v751_v28 = vpop.xlane.xlu0 %750 }
 0x6bd   : > { %1759 = vrcp.f32 %v751_v28 }
 0x6c0   : > { %v748_v29 = vpop.xlane.xlu0 %747 }
 0x6c1   : > { %1761 = vrcp.f32 %v748_v29 }
 0x6c4   : > { %v759_v31 = vpop.permute.xlu0 %758 }
 0x6c5   : > { %1613 = vmatprep.subr.mxu0 %v759_v31 }
 0x6c6   : > { %1614 = vmatpush3.msra.mxu0 %v759_v31 }
 0x6c7   : > { %1615 = vmatprep.subr.mxu0 %v757_v30 }
 0x6c8   : > { %1616 = vmatpush3.msra.mxu0 %v757_v30  ;;  %v844_v40 = vpop.permute.xlu0 %843 }
 0x6c9   : > { %1620 = vmatprep.subr.msk.mxu0 %vm441_vm1, %v850_v32 }
 0x6ca   : > { %v1760_v33 = vpop.eup %1759 }
 0x6cb   : > { %v755_v38 = vmul.f32 %v1760_v33, %v1756_v24 }
 0x6ce   : > { %v1762_v36 = vpop.eup %1761 }
 0x6cf   : > { %v753_v37 = vmul.f32 %v1762_v36, %v1758_v26 }
 0x6d1   : > { %1617 = vmatprep.mubr.msk.f32.mxu0 %vm529_vm3, %v753_v37 }
 0x6d2   : > { %1618 = vmatmul.mubr.msk.f32.vlgmr.msra.gmra.mxu0 %vm529_vm3, %v755_v38 }
 0x6d3   : > { %1621 = vmatpush3.xpose.msk.msra.mxu0 %vm441_vm1, %v850_v32  ;;  %1624 = vmatprep.mubr.msk.f32.mxu0 %vm441_vm1, %v844_v40 }
 0x6d4   : > { %1622 = vmatprep.subr.msk.mxu0 %vm441_vm1, %v848_v41 }
 0x6d7   : > { %1623 = vmatpush3.xpose.msk.msra.mxu0 %vm441_vm1, %v848_v41 }
 0x6da   : > { %1625 = vmatmul.mubr.msk.f32.vlgmr.msra.gmra.mxu0 %vm441_vm1, %v846_v42 }
 0x792   : > { %v2220_v43 = vpop.f32.mrf.mxu0 }
 0x794   : > { %v2222_v44 = vpop.f32.mrf.mxu0 }
 0x79a   : > { %v1626_v45 = vpop.f32.mrf.mxu0 }
 0x79b   : > { %v935_v46 = vmul.f32 0.35355338, %v1626_v45  ;;  %v1283_v45 = vld [vmem:[#allocation7 + $0x8] sm:$0xff] }
 0x79c   : > { %v925_v47 = vpop.f32.mrf.mxu0 }
 0x79d   : > { %v934_v48 = vmul.f32 0.35355338, %v925_v47  ;;  %v937_v49 = vsel %vm434_vm2, %v935_v46, -1e+30  ;;  %v1282_v46 = vld [vmem:[#allocation7] sm:$0xff] }
 0x79e   : > { %v941_v50 = vsel %vm529_vm3, %v937_v49, -inf }
 0x79f   : > { %942 = vmax.xlane.f32.xlu1 %v941_v50  ;;  %v936_v51 = vsel %vm434_vm2, %v934_v48, -1e+30 }
 0x7a0   : > { %v938_v52 = vsel %vm529_vm3, %v936_v51, -inf }
 0x7a1   : > { %939 = vmax.xlane.f32.xlu0 %v938_v52 }
 0x7b0   : > { %960 = vrot.lane.b32.xlu1 %v2158_v35, %s1941_s9 }
 0x7b4   : > { %1053 = vrot.lane.b32.xlu1 %v2155_v34, %s1942_s18 }
 0x7b8   : > { %1051 = vrot.lane.b32.xlu1 %v2158_v35, %s1942_s18  ;;  %s2281_s18 = scalar_lea.hbm %s2335_s6, %s1536_s8 }
 0x7bc   : > { %1049 = vrot.lane.b32.xlu1 %v2155_v34, %s1943_s27 }
 0x828   : > { %v943_v53 = vpop.xlane.xlu1 %942 }
 0x829   : > { %v945_v54 = vsub.f32 %v937_v49, %v943_v53 }
 0x82a   : > { %v940_v55 = vpop.xlane.xlu0 %939 }
 0x82b   : > { %v948_v56 = vmul.f32 1.442695, %v945_v54  ;;  %v944_v57 = vsub.f32 %v936_v51, %v940_v55 }
 0x82c   : > { %v961_v3 = vpop.permute.xlu1 %960 }
 0x82d   : > { %1763 = vpow2.f32 %v948_v56  ;;  %v946_v58 = vmul.f32 1.442695, %v944_v57 }
 0x82f   : > { %1765 = vpow2.f32 %v946_v58 }
 0x830   : > { %v1054_v5 = vpop.permute.xlu1 %1053 }
 0x834   : > { %v1052_v13 = vpop.permute.xlu1 %1051 }
 0x838   : > { %v1050_v14 = vpop.permute.xlu1 %1049 }
 0x83a   : > { %v1764_v59 = vpop.eup %1763 }
 0x83b   : > { %v953_v60 = vsel %vm529_vm3, %v1764_v59, 0.0 }
 0x83c   : > { %v1766_v61 = vpop.eup %1765  ;;  %954 = vadd.xlane.f32.xlu0 %v953_v60 }
 0x83d   : > { %v950_v62 = vsel %vm529_vm3, %v1766_v61, 0.0 }
 0x840   : > { %951 = vadd.xlane.f32.xlu0 %v950_v62 }
 0x856   : > { %962 = vrot.lane.b32.xlu0 %v2155_v34, %s1941_s9 }
 0x85a   : > { %1047 = vrot.lane.b32.xlu0 %v2158_v35, %s1943_s27  ;;  %s1948_s27 = smov [#allocation8]  }
 0x8c5   : > { %v955_v63 = vpop.xlane.xlu0 %954 }
 0x8c6   : > { %1767 = vrcp.f32 %v955_v63 }
 0x8c9   : > { %v952_v2 = vpop.xlane.xlu0 %951 }
 0x8ca   : > { %1769 = vrcp.f32 %v952_v2 }
 0x8cd   : > { %v963_v4 = vpop.permute.xlu0 %962 }
 0x8ce   : > { %1627 = vmatprep.subr.mxu1 %v963_v4 }
 0x8cf   : > { %1628 = vmatpush3.msra.mxu1 %v963_v4 }
 0x8d0   : > { %1629 = vmatprep.subr.mxu1 %v961_v3 }
 0x8d1   : > { %1630 = vmatpush3.msra.mxu1 %v961_v3  ;;  %v1048_v12 = vpop.permute.xlu0 %1047 }
 0x8d2   : > { %1634 = vmatprep.subr.msk.mxu1 %vm441_vm1, %v1054_v5 }
 0x8d3   : > { %v1768_v6 = vpop.eup %1767 }
 0x8d4   : > { %v959_v11 = vmul.f32 %v1768_v6, %v1764_v59 }
 0x8d7   : > { %v1770_v7 = vpop.eup %1769 }
 0x8d8   : > { %v957_v10 = vmul.f32 %v1770_v7, %v1766_v61 }
 0x8da   : > { %1631 = vmatprep.mubr.msk.f32.mxu1 %vm529_vm3, %v957_v10 }
 0x8db   : > { %1632 = vmatmul.mubr.msk.f32.vlgmr.msra.gmra.mxu1 %vm529_vm3, %v959_v11 }
 0x8dc   : > { %1635 = vmatpush3.xpose.msk.msra.mxu1 %vm441_vm1, %v1054_v5  ;;  %1638 = vmatprep.mubr.msk.f32.mxu1 %vm441_vm1, %v1048_v12 }
 0x8dd   : > { %1636 = vmatprep.subr.msk.mxu1 %vm441_vm1, %v1052_v13 }
 0x8e0   : > { %1637 = vmatpush3.xpose.msk.msra.mxu1 %vm441_vm1, %v1052_v13 }
 0x8e3   : > { %1639 = vmatmul.mubr.msk.f32.vlgmr.msra.gmra.mxu1 %vm441_vm1, %v1050_v14 }
 0x99b   : > { %v1633_v15 = vpop.f32.mrf.mxu1 }
 0x99d   : > { %v1038_v16 = vpop.f32.mrf.mxu1 }
 0x9a3   : > { %v1640_v17 = vpop.f32.mrf.mxu1 }
 0x9a4   : > { %v1139_v18 = vmul.f32 0.35355338, %v1640_v17 }
 0x9a5   : > { %v1129_v19 = vpop.f32.mrf.mxu1 }
 0x9a6   : > { %v1138_v20 = vmul.f32 0.35355338, %v1129_v19  ;;  %v1141_v21 = vsel %vm434_vm2, %v1139_v18, -1e+30 }
 0x9a7   : > { %v1145_v22 = vsel %vm529_vm3, %v1141_v21, -inf }
 0x9a8   : > { %1146 = vmax.xlane.f32.xlu1 %v1145_v22  ;;  %v1140_v23 = vsel %vm434_vm2, %v1138_v20, -1e+30 }
 0x9a9   : > { %v1142_v24 = vsel %vm529_vm3, %v1140_v23, -inf }
 0x9aa   : > { %1143 = vmax.xlane.f32.xlu0 %v1142_v24 }
 0x9b9   : > { %1164 = vrot.lane.b32.xlu1 %v2158_v35, %s1944_s29 }
 0x9bd   : > { %1253 = vrot.lane.b32.xlu1 %v2222_v44, %s1945_s15  ;;  %v1284_v44 = vld [vmem:[#allocation7 + $0x10] sm:$0xff] }
 0x9c1   : > { %1255 = vrot.lane.b32.xlu1 %v2220_v43, %s1945_s15 }
 0x9c5   : > { %1263 = vrot.lane.b32.xlu1 %v1633_v15, %s1946_s17 }
 0xa31   : > { %v1147_v25 = vpop.xlane.xlu1 %1146 }
 0xa32   : > { %v1149_v26 = vsub.f32 %v1141_v21, %v1147_v25 }
 0xa33   : > { %v1144_v27 = vpop.xlane.xlu0 %1143 }
 0xa34   : > { %v1152_v39 = vmul.f32 1.442695, %v1149_v26  ;;  %v1148_v28 = vsub.f32 %v1140_v23, %v1144_v27 }
 0xa35   : > { %v1165_v38 = vpop.permute.xlu1 %1164 }
 0xa36   : > { %1771 = vpow2.f32 %v1152_v39  ;;  %v1150_v29 = vmul.f32 1.442695, %v1148_v28 }
 0xa38   : > { %1773 = vpow2.f32 %v1150_v29 }
 0xa39   : > { %v1254_v49 = vpop.permute.xlu1 %1253 }
 0xa3a   : > { %v1275_v53 = vsel %vm441_vm1, %v2196_v9, %v1254_v49  ;;  %v1529_v9 = vld [vmem:[%s2334_s5] ss:$0 sm:$0xff] }
 0xa3d   : > { %v1256_v50 = vpop.permute.xlu1 %1255 }
 0xa3e   : > { %v1276_v55 = vsel %vm441_vm1, %v2194_v8, %v1256_v50 }
 0xa41   : > { %v1264_v51 = vpop.permute.xlu1 %1263 }
 0xa42   : > { %v1278_v58 = vsel %vm529_vm3, %v1276_v55, %v1264_v51 }
 0xa43   : > { %v1772_v30 = vpop.eup %1771 }
 0xa44   : > { %v1157_v35 = vsel %vm529_vm3, %v1772_v30, 0.0 }
 0xa45   : > { %v1774_v31 = vpop.eup %1773  ;;  %1158 = vadd.xlane.f32.xlu0 %v1157_v35 }
 0xa46   : > { %v1154_v32 = vsel %vm529_vm3, %v1774_v31, 0.0 }
 0xa49   : > { %1155 = vadd.xlane.f32.xlu0 %v1154_v32 }
 0xa5f   : > { %1166 = vrot.lane.b32.xlu0 %v2155_v34, %s1944_s29  ;;  %v1285_v34 = vld [vmem:[#allocation7 + $0x18] sm:$0xff]  ;;  %s1863_s29 = sshll.u32 %s1948_s27, 4  ;;  %s1864_s29 = int_to_ptr.vmem [resolvable:$false] %s1863_s29 }
 0xa60   : > { %p1866_p13 = scmp.lt.s32.totalorder %s2284_s26, %s1864_s29 }
 0xa63   : > { %1261 = vrot.lane.b32.xlu0 %v1038_v16, %s1946_s17  ;;  %s1865_s17 = scalar_lea.vmem %s1864_s29, 512 }
 0xa64   : > { %p1867_p0 = scmp.lt.s32.totalorder %s1865_s17, %s1859_s13 }
 0xa66   : > { %p1868_p10 = por %p1867_p0, %p1866_p13 }
 0xa68   : > { %p1869_p3 = pnand %p1868_p10, %p1862_p12 }
 0xace   : > { %v1159_v33 = vpop.xlane.xlu0 %1158 }
 0xacf   : > { %1775 = vrcp.f32 %v1159_v33 }
 0xad2   : > { %v1156_v36 = vpop.xlane.xlu0 %1155 }
 0xad3   : > { %1777 = vrcp.f32 %v1156_v36 }
 0xad6   : > { %v1167_v37 = vpop.permute.xlu0 %1166 }
 0xad7   : > { %1641 = vmatprep.subr.mxu0 %v1167_v37 }
 0xad8   : > { %1642 = vmatpush3.msra.mxu0 %v1167_v37 }
 0xad9   : > { %1643 = vmatprep.subr.mxu0 %v1165_v38 }
 0xada   : > { %1644 = vmatpush3.msra.mxu0 %v1165_v38  ;;  %v1262_v52 = vpop.permute.xlu0 %1261 }
 0xadb   : > { %1648 = vmatprep.subr.mxu0 %v1285_v34  ;;  %v1277_v56 = vsel %vm529_vm3, %v1275_v53, %v1262_v52 }
 0xadc   : > { %v1776_v40 = vpop.eup %1775 }
 0xadd   : > { %v1163_v43 = vmul.f32 %v1776_v40, %v1772_v30 }
 0xae0   : > { %v1778_v41 = vpop.eup %1777 }
 0xae1   : > { %v1161_v42 = vmul.f32 %v1778_v41, %v1774_v31 }
 0xae3   : > { %1645 = vmatprep.mubr.msk.f32.mxu0 %vm529_vm3, %v1161_v42 }
 0xae4   : > { %1646 = vmatmul.mubr.msk.f32.vlgmr.msra.gmra.mxu0 %vm529_vm3, %v1163_v43 }
 0xae5   : > { %1649 = vmatpush3.msra.mxu0 %v1285_v34 }
 0xae6   : > { %1650 = vmatprep.subr.mxu0 %v1284_v44 }
 0xae7   : > { %1651 = vmatpush3.msra.mxu0 %v1284_v44 }
 0xae8   : > { %1652 = vmatprep.subr.mxu0 %v1283_v45 }
 0xae9   : > { %1653 = vmatpush3.msra.mxu0 %v1283_v45 }
 0xaea   : > { %1654 = vmatprep.subr.mxu0 %v1282_v46 }
 0xaeb   : > { %1655 = vmatpush3.msra.mxu0 %v1282_v46 }
 0xba4   : > { %v1647_v47 = vpop.f32.mrf.mxu0 }
 0xba5   : > { %1271 = vrot.lane.b32.xlu1 %v1647_v47, %s1947_s20 }
 0xba6   : > { %v1242_v48 = vpop.f32.mrf.mxu0 }
 0xba7   : > { %1269 = vrot.lane.b32.xlu0 %v1242_v48, %s1947_s20 }
 0xc17   : > { %v1272_v54 = vpop.permute.xlu1 %1271 }
 0xc18   : > { %v1281_v60 = vsel %vm1279_vm4, %v1278_v58, %v1272_v54 }
 0xc19   : > { %v1270_v57 = vpop.permute.xlu0 %1269 }
 0xc1a   : > { %v1280_v59 = vsel %vm1279_vm4, %v1277_v56, %v1270_v57 }
 0xc1b   : > { %1656 = vmatprep.mubr.msk.f32.mxu0 %vm303_vm0, %v1280_v59 }
 0xc1c   : > { %1657 = vmatmul.mubr.msk.f32.vlgmr.msra.gmra.mxu0 %vm303_vm0, %v1281_v60 }
 0xcdc   : > { %v1658_v61 = vpop.f32.mrf.mxu0 }
 0xcdd   : > { %v1368_v8 = vadd.f32 %v1658_v61, %v2137_v1 }
 0xcde   : > { %v1358_v62 = vpop.f32.mrf.mxu0 }
 0xcdf   : > { %v1377_v63 = vadd.f32 %v1529_v9, %v1368_v8  ;;  %v1367_v2 = vadd.f32 %v1358_v62, %v2135_v0 }
 0xce1   : > { %1379 = vst.msk [vmem:[%s298_s10 + $0x8] sm:$0xff] %vm303_vm0, %v1377_v63  ;;  %v1376_v3 = vadd.f32 %v1529_v9, %v1367_v2 }
 0xce3   : > { %1378 = vst.msk [vmem:[%s298_s10] sm:$0xff] %vm303_vm0, %v1376_v3 }
 0xce4   : > { %1872 = shalt.err (!%p1869_p3)
}
 0xce5   : > { %s1873_s20 = scalar_lea.hbm %s2281_s18, 256  ;;  %s1877_s8 = scalar_lea.hbm %s2335_s6, 512 }
 0xce6   : > { %p1874_p11 = scmp.ne.s32.totalorder %s2281_s18, %s1873_s20  ;;  %p1878_p4 = scmp.lt.s32.totalorder %s2281_s18, %s2335_s6 }
 0xce7   : > { %p1879_p6 = scmp.lt.s32.totalorder %s1877_s8, %s1873_s20 }
 0xce8   : > { %p1875_p9 = pnand %p1874_p11, %p2354_p2 }
 0xce9   : > { %p1880_p8 = por %p1879_p6, %p1878_p4 }
 0xcea   : > { %p1876_p1 = pneg %p1875_p9 }
 0xcec   : > { %p1881_p5 = pnand %p1880_p8, %p1876_p1 }
 0xcee   : > { %1884 = shalt.err (!%p1881_p5)
}
 0xcef   : > { %s1949_s9 = smov 128  }
 0xcf0   : > { %1669 = dma.vmem_to_hbm [thread:$0]  (%p2354_p2), %s2284_s26, 256, %s2281_s18, %s1381_s25, %s1949_s9, %s1949_s9, %s1945_s15  }
 0xcf1 PF: > { %s1409_s13 = sand.u32 1, %s1915_s21   ;;  %p2355_p7 = scmp.ne.s32.totalorder %s2343_s28, 0 }
 0xcf2   : > { %p2356_p12 = scmp.ge.s32.totalorder %s1927_s24, 2  ;;  %s1410_s27 = scalar_lea.sflag [#allocation4], %s1409_s13 }
 0xcf4   : > { %p1683_p13 = pnand %p2356_p12, %p2355_p7 }
 0xcf6   : > { %p1684_p0 = pneg %p1683_p13 }
 0xcf8   : > { %1910 = dma.done.wait (%p1684_p0), %s1410_s27, 256  }
 0xcf9   : > { %1912 = vsyncadd (%p1684_p0), %s1410_s27, 4294967040  ;;  %p20_p10 = scmp.ge.s32.totalorder %s2063_s19, 4   ;;  %s2357_s21 = smov %s1919_s22 }
 0xcfa   : > { %s2358_s22 = smov %s1923_s23  ;;  %s2359_s23 = smov %s2079_s7 }
 0xcfb   : > { %s2360_s24 = smov %s2063_s19  ;;  %22 = sbr.rel (!%p20_p10) target bundleno = 6 (0x6), region = 97 }
 0xd00   :  { %1415 = vsyncpa [#allocation3], 1 }
 0xd01   :  { %1417 = vsyncpa [#allocation3 + $0x1], 1 }
 0xd02   :  { %1418 = vsyncpa [#allocation6], 1 }
 0xd03   :  { %1419 = vsyncpa [#allocation4], 1 }
 0xd04   :  { %1421 = vsyncpa [#allocation4 + $0x1], 1 }

</bundles_post_ra>
